<compile_context>
chip_gen: v7x
topology: tpu7x:2x2x1
jax: 0.10.0
libtpu: 0.0.40
codegen_flags: <defaults>
</compile_context>

<pallas_src>
import functools

import jax
import jax.numpy as jnp
from jax.experimental import pallas as pl
from jax.experimental.pallas import tpu as pltpu

MAX_BATCH_TILE = 8           # cap on the static batch unroll inside the kernel
VMEM_BLOCK_BUDGET = 8 << 20  # ~bytes of VMEM for the double-buffered blocks


def hfm_kernel(yr_ref, yi_ref, filt_ref, w1r_ref, w1i_ref, b1_ref,
               w2r_ref, w2i_ref, b2r_ref, b2i_ref, or_ref, oi_ref):
    """One (Bt, c, TN) block: Gaussian mul + conv1(1x1) + ReLU + conv2(1x1)."""
    g = filt_ref[...]                       # (1, TN) real Gaussian, lane-dense
    w1r = w1r_ref[...]                      # (2c, c)  columns of W1 for real half
    w1i = w1i_ref[...]                      # (2c, c)  columns of W1 for imag half
    b1 = b1_ref[...]                        # (2c, 1)
    w2r = w2r_ref[...]                      # (c, 2c)  rows of W2 -> real output
    w2i = w2i_ref[...]                      # (c, 2c)  rows of W2 -> imag output
    b2r = b2r_ref[...]                      # (c, 1)
    b2i = b2i_ref[...]                      # (c, 1)

    bt = yr_ref.shape[0]
    for b in range(bt):                     # static unroll over the batch block
        # Real-valued filter scales real and imaginary halves identically.
        xr = yr_ref[b] * g                  # (c, TN), sublane broadcast of g
        xi = yi_ref[b] * g
        h1 = (jnp.dot(w1r, xr, preferred_element_type=jnp.float32)
              + jnp.dot(w1i, xi, preferred_element_type=jnp.float32) + b1)
        h1 = jnp.maximum(h1, 0.0)           # ReLU(conv1)
        or_ref[b] = jnp.dot(w2r, h1, preferred_element_type=jnp.float32) + b2r
        oi_ref[b] = jnp.dot(w2i, h1, preferred_element_type=jnp.float32) + b2i


def _choose_tiles(batch, c, hw, budget_bytes=VMEM_BLOCK_BUDGET):
    """Pick (batch_tile, pixel_tile) so the per-step VMEM footprint (double-
    buffered real/imag inputs + real/imag outputs + h1 temporaries, roughly
    48 * c bytes per (batch, pixel) element in f32) stays within budget."""
    max_bt_tn = max(budget_bytes // (48 * c), 128)
    bt_cap = max(1, min(batch, MAX_BATCH_TILE))
    if hw <= max_bt_tn:
        bt = max(1, min(bt_cap, max_bt_tn // hw))
        return bt, hw                       # full spatial extent per step
    tn = min((max_bt_tn // 128) * 128, hw)  # 128-aligned lane tile
    return 1, max(tn, 128)


def hfm_conv_pallas(yr, yi, filt, w1r, w1i, b1, w2r, w2i, b2r, b2i):
    """Gaussian mul + conv1(1x1) + ReLU + conv2(1x1), pixels on lanes.

    yr, yi:     (B, c, HW) f32   real / imag halves of the filtered spectrum
    filt:       (1, HW)    f32   per-pixel Gaussian (shared over batch/chan)
    w1r, w1i:   (2c, c)    f32   column split of W1 (out, in)
    b1:         (2c, 1)    f32
    w2r, w2i:   (c, 2c)    f32   row split of W2
    b2r, b2i:   (c, 1)     f32
    returns (o_real, o_imag), each (B, c, HW) f32.
    """
    B, C, HW = yr.shape
    C2 = 2 * C
    bt, tn = _choose_tiles(B, C, HW)
    grid = (pl.cdiv(HW, tn), pl.cdiv(B, bt))   # pixel outer, batch inner

    data_spec = pl.BlockSpec((bt, C, tn), lambda pi, bi: (bi, 0, pi))
    filt_spec = pl.BlockSpec((1, tn), lambda pi, bi: (0, pi))

    def const_spec(shape):
        return pl.BlockSpec(shape, lambda pi, bi, _s=shape: (0,) * len(_s))

    return pl.pallas_call(
        hfm_kernel,
        out_shape=(jax.ShapeDtypeStruct((B, C, HW), jnp.float32),
                   jax.ShapeDtypeStruct((B, C, HW), jnp.float32)),
        grid_spec=pltpu.PrefetchScalarGridSpec(
            num_scalar_prefetch=0,
            grid=grid,
            in_specs=[
                data_spec,                  # yr
                data_spec,                  # yi
                filt_spec,                  # gaussian
                const_spec((C2, C)),        # W1 (real columns)
                const_spec((C2, C)),        # W1 (imag columns)
                const_spec((C2, 1)),        # b1
                const_spec((C, C2)),        # W2 (real rows)
                const_spec((C, C2)),        # W2 (imag rows)
                const_spec((C, 1)),         # b2 (real)
                const_spec((C, 1)),         # b2 (imag)
            ],
            out_specs=[data_spec, data_spec],
        ),
        compiler_params=pltpu.CompilerParams(
            # batch blocks and pixel tiles are independent -> shard across TCs
            dimension_semantics=("parallel", "parallel"),
            # larger-than-default blocks; safe on v5e/v6e (128 MiB) and v7x (64 MiB)
            vmem_limit_bytes=32 << 20),
    )(yr, yi, filt, w1r, w1i, b1, w2r, w2i, b2r, b2i)


def make_gaussian(h, w, sigma=7.0):
    yv = jnp.arange(h, dtype=jnp.float32)[:, None]
    xv = jnp.arange(w, dtype=jnp.float32)[None, :]
    y_idx = jnp.float32(h // 2)
    x_idx = jnp.float32(w // 2)
    return jnp.exp(-((yv - y_idx) ** 2 + (xv - x_idx) ** 2) / (2.0 * sigma ** 2))


@jax.jit
def hfm_forward(x, params):
    """x: (b, c, h, w) float32  ->  (b, c, h, w) float32."""
    b, c, h, w = x.shape
    x = x.astype(jnp.float32)

    # TODO(synk): fft2/ifft2 have no Pallas TPU equivalent; done in plain JAX.
    y = jnp.fft.fft2(x)                                       # complex64, axes (-2,-1)

    # No concat: feed real/imag halves separately (free reshapes, no HBM pass).
    yr = jnp.real(y).reshape(b, c, h * w)                     # (b, c, hw)
    yi = jnp.imag(y).reshape(b, c, h * w)                     # (b, c, hw)
    filt = make_gaussian(h, w).reshape(1, h * w)              # (1, hw)

    # Split W1 by input columns (real/imag halves) and W2 by output rows;
    # these are tiny host-side slices, constant-folded under jit.
    w1, b1, w2, b2 = params["w1"], params["b1"], params["w2"], params["b2"]
    w1r, w1i = w1[:, :c], w1[:, c:]
    w2r, w2i = w2[:c, :], w2[c:, :]
    b2r, b2i = b2[:c], b2[c:]

    o_real, o_imag = hfm_conv_pallas(yr, yi, filt, w1r, w1i, b1,
                                     w2r, w2i, b2r, b2i)       # 2x (b, c, hw)

    o_real = o_real.reshape(b, c, h, w)
    o_imag = o_imag.reshape(b, c, h, w)
    y_spatial = jnp.real(jnp.fft.ifft2(o_real + 1j * o_imag))  # .float() drops imag
    return x + y_spatial.astype(jnp.float32)


def hfm_reference(x, params):
    """Pure-JAX mirror of the PyTorch forward for a numeric sanity check."""
    b, c, h, w = x.shape
    x = x.astype(jnp.float32)
    y = jnp.fft.fft2(x)
    g = make_gaussian(h, w)
    y = y * g[None, None]
    y_f = jnp.concatenate([jnp.real(y), jnp.imag(y)], axis=1)       # (b, 2c, h, w)
    z = jnp.einsum("oi,bihw->bohw", params["w1"], y_f) + params["b1"].reshape(1, -1, 1, 1)
    z = jnp.maximum(z, 0.0)
    z = jnp.einsum("oi,bihw->bohw", params["w2"], z) + params["b2"].reshape(1, -1, 1, 1)
    zr, zi = jnp.split(z, 2, axis=1)
    return x + jnp.real(jnp.fft.ifft2(zr + 1j * zi)).astype(jnp.float32)


def init_params(num_channels, key):
    c2 = 2 * num_channels
    k1, k2, k3, k4 = jax.random.split(key, 4)
    bound = 1.0 / (c2 ** 0.5)                    # PyTorch conv default init bound
    w1 = jax.random.uniform(k1, (c2, c2), jnp.float32, -bound, bound)  # (out, in)
    b1 = jax.random.uniform(k2, (c2,), jnp.float32, -bound, bound)
    w2 = jax.random.uniform(k3, (c2, c2), jnp.float32, -bound, bound)
    b2 = jax.random.uniform(k4, (c2,), jnp.float32, -bound, bound)
    return {"w1": w1, "b1": b1.reshape(c2, 1),
            "w2": w2, "b2": b2.reshape(c2, 1)}


if __name__ == "__main__":
    key = jax.random.PRNGKey(0)
    kx, kp = jax.random.split(key)

    b, c, h, w = 2, 4, 16, 16
    x = jax.random.normal(kx, (b, c, h, w), dtype=jnp.float32)
    params = init_params(c, kp)

    out = jax.block_until_ready(hfm_forward(x, params))
    ref = jax.block_until_ready(hfm_reference(x, params))

    assert out.shape == (b, c, h, w)
    assert jnp.allclose(out, ref, rtol=1e-4, atol=1e-3), "mismatch vs reference"
    print("KERNEL_OK")
</pallas_src>

<mosaic_0001>
module attributes {stable_mosaic.version = 11 : i64} {
  func.func @hfm_kernel(%arg0: i32, %arg1: i32, %arg2: memref<2x4x256xf32, #tpu.memory_space<vmem>>, %arg3: memref<2x4x256xf32, #tpu.memory_space<vmem>>, %arg4: memref<1x256xf32, #tpu.memory_space<vmem>>, %arg5: memref<8x4xf32, #tpu.memory_space<vmem>>, %arg6: memref<8x4xf32, #tpu.memory_space<vmem>>, %arg7: memref<8x1xf32, #tpu.memory_space<vmem>>, %arg8: memref<4x8xf32, #tpu.memory_space<vmem>>, %arg9: memref<4x8xf32, #tpu.memory_space<vmem>>, %arg10: memref<4x1xf32, #tpu.memory_space<vmem>>, %arg11: memref<4x1xf32, #tpu.memory_space<vmem>>, %arg12: memref<2x4x256xf32, #tpu.memory_space<vmem>>, %arg13: memref<2x4x256xf32, #tpu.memory_space<vmem>>) attributes {dimension_semantics = [#tpu.dimension_semantics<parallel>, #tpu.dimension_semantics<parallel>], iteration_bounds = array<i64: 1, 1>, scalar_prefetch = 0 : i64, scratch_operands = 0 : i64, tpu.core_type = #tpu.core_type<tc>, window_params = [{transform_indices = @transform_0, window_bounds = array<i64: 2, 4, 256>}, {transform_indices = @transform_1, window_bounds = array<i64: 2, 4, 256>}, {transform_indices = @transform_2, window_bounds = array<i64: 1, 256>}, {pipeline_mode = #tpu.pipeline_mode<synchronous>, transform_indices = @transform_3, window_bounds = array<i64: 8, 4>}, {pipeline_mode = #tpu.pipeline_mode<synchronous>, transform_indices = @transform_4, window_bounds = array<i64: 8, 4>}, {pipeline_mode = #tpu.pipeline_mode<synchronous>, transform_indices = @transform_5, window_bounds = array<i64: 8, 1>}, {pipeline_mode = #tpu.pipeline_mode<synchronous>, transform_indices = @transform_6, window_bounds = array<i64: 4, 8>}, {pipeline_mode = #tpu.pipeline_mode<synchronous>, transform_indices = @transform_7, window_bounds = array<i64: 4, 8>}, {pipeline_mode = #tpu.pipeline_mode<synchronous>, transform_indices = @transform_8, window_bounds = array<i64: 4, 1>}, {pipeline_mode = #tpu.pipeline_mode<synchronous>, transform_indices = @transform_9, window_bounds = array<i64: 4, 1>}, {transform_indices = @transform_10, window_bounds = array<i64: 2, 4, 256>}, {transform_indices = @transform_11, window_bounds = array<i64: 2, 4, 256>}]} {
    %c0 = arith.constant 0 : index
    %c0_0 = arith.constant 0 : index
    %0 = vector.load %arg4[%c0, %c0_0] : memref<1x256xf32, #tpu.memory_space<vmem>>, vector<1x256xf32>
    %c0_1 = arith.constant 0 : index
    %c0_2 = arith.constant 0 : index
    %1 = vector.load %arg5[%c0_1, %c0_2] : memref<8x4xf32, #tpu.memory_space<vmem>>, vector<8x4xf32>
    %c0_3 = arith.constant 0 : index
    %c0_4 = arith.constant 0 : index
    %2 = vector.load %arg6[%c0_3, %c0_4] : memref<8x4xf32, #tpu.memory_space<vmem>>, vector<8x4xf32>
    %c0_5 = arith.constant 0 : index
    %c0_6 = arith.constant 0 : index
    %3 = vector.load %arg7[%c0_5, %c0_6] : memref<8x1xf32, #tpu.memory_space<vmem>>, vector<8x1xf32>
    %c0_7 = arith.constant 0 : index
    %c0_8 = arith.constant 0 : index
    %4 = vector.load %arg8[%c0_7, %c0_8] : memref<4x8xf32, #tpu.memory_space<vmem>>, vector<4x8xf32>
    %c0_9 = arith.constant 0 : index
    %c0_10 = arith.constant 0 : index
    %5 = vector.load %arg9[%c0_9, %c0_10] : memref<4x8xf32, #tpu.memory_space<vmem>>, vector<4x8xf32>
    %c0_11 = arith.constant 0 : index
    %c0_12 = arith.constant 0 : index
    %6 = vector.load %arg10[%c0_11, %c0_12] : memref<4x1xf32, #tpu.memory_space<vmem>>, vector<4x1xf32>
    %c0_13 = arith.constant 0 : index
    %c0_14 = arith.constant 0 : index
    %7 = vector.load %arg11[%c0_13, %c0_14] : memref<4x1xf32, #tpu.memory_space<vmem>>, vector<4x1xf32>
    %c0_15 = arith.constant 0 : index
    %c0_16 = arith.constant 0 : index
    %c0_17 = arith.constant 0 : index
    %8 = vector.load %arg2[%c0_15, %c0_16, %c0_17] : memref<2x4x256xf32, #tpu.memory_space<vmem>>, vector<1x4x256xf32>
    %9 = vector.shape_cast %8 : vector<1x4x256xf32> to vector<4x256xf32>
    %10 = vector.broadcast %0 : vector<1x256xf32> to vector<4x256xf32>
    %11 = arith.mulf %9, %10 : vector<4x256xf32>
    %c0_18 = arith.constant 0 : index
    %c0_19 = arith.constant 0 : index
    %c0_20 = arith.constant 0 : index
    %12 = vector.load %arg3[%c0_18, %c0_19, %c0_20] : memref<2x4x256xf32, #tpu.memory_space<vmem>>, vector<1x4x256xf32>
    %13 = vector.shape_cast %12 : vector<1x4x256xf32> to vector<4x256xf32>
    %14 = vector.broadcast %0 : vector<1x256xf32> to vector<4x256xf32>
    %15 = arith.mulf %13, %14 : vector<4x256xf32>
    %cst = arith.constant dense<0.000000e+00> : vector<8x256xf32>
    %16 = tpu.matmul %1, %11, %cst {dimension_numbers = #tpu.dot_dimension_numbers<[1], [0], [0], [1], [0, 0, 1, 1], [], []>} : vector<8x4xf32>, vector<4x256xf32>, vector<8x256xf32> -> vector<8x256xf32>
    %cst_21 = arith.constant dense<0.000000e+00> : vector<8x256xf32>
    %17 = tpu.matmul %2, %15, %cst_21 {dimension_numbers = #tpu.dot_dimension_numbers<[1], [0], [0], [1], [0, 0, 1, 1], [], []>} : vector<8x4xf32>, vector<4x256xf32>, vector<8x256xf32> -> vector<8x256xf32>
    %18 = arith.addf %16, %17 : vector<8x256xf32>
    %19 = vector.broadcast %3 : vector<8x1xf32> to vector<8x256xf32>
    %20 = arith.addf %18, %19 : vector<8x256xf32>
    %cst_22 = arith.constant 0.000000e+00 : f32
    %21 = vector.broadcast %cst_22 : f32 to vector<8x256xf32>
    %22 = arith.maximumf %20, %21 : vector<8x256xf32>
    %cst_23 = arith.constant dense<0.000000e+00> : vector<4x256xf32>
    %23 = tpu.matmul %4, %22, %cst_23 {dimension_numbers = #tpu.dot_dimension_numbers<[1], [0], [0], [1], [0, 0, 1, 1], [], []>} : vector<4x8xf32>, vector<8x256xf32>, vector<4x256xf32> -> vector<4x256xf32>
    %24 = vector.broadcast %6 : vector<4x1xf32> to vector<4x256xf32>
    %25 = arith.addf %23, %24 : vector<4x256xf32>
    %c0_24 = arith.constant 0 : index
    %c0_25 = arith.constant 0 : index
    %c0_26 = arith.constant 0 : index
    %26 = vector.load %arg12[%c0_24, %c0_25, %c0_26] : memref<2x4x256xf32, #tpu.memory_space<vmem>>, vector<1x4x256xf32>
    %27 = vector.shape_cast %26 : vector<1x4x256xf32> to vector<4x256xf32>
    %28 = vector.shape_cast %25 : vector<4x256xf32> to vector<1x4x256xf32>
    tpu.vector_store %arg12[%c0_24, %c0_25, %c0_26], %28 {strides = array<i32>} : memref<2x4x256xf32, #tpu.memory_space<vmem>>, vector<1x4x256xf32>,
    %cst_27 = arith.constant dense<0.000000e+00> : vector<4x256xf32>
    %29 = tpu.matmul %5, %22, %cst_27 {dimension_numbers = #tpu.dot_dimension_numbers<[1], [0], [0], [1], [0, 0, 1, 1], [], []>} : vector<4x8xf32>, vector<8x256xf32>, vector<4x256xf32> -> vector<4x256xf32>
    %30 = vector.broadcast %7 : vector<4x1xf32> to vector<4x256xf32>
    %31 = arith.addf %29, %30 : vector<4x256xf32>
    %c0_28 = arith.constant 0 : index
    %c0_29 = arith.constant 0 : index
    %c0_30 = arith.constant 0 : index
    %32 = vector.load %arg13[%c0_28, %c0_29, %c0_30] : memref<2x4x256xf32, #tpu.memory_space<vmem>>, vector<1x4x256xf32>
    %33 = vector.shape_cast %32 : vector<1x4x256xf32> to vector<4x256xf32>
    %34 = vector.shape_cast %31 : vector<4x256xf32> to vector<1x4x256xf32>
    tpu.vector_store %arg13[%c0_28, %c0_29, %c0_30], %34 {strides = array<i32>} : memref<2x4x256xf32, #tpu.memory_space<vmem>>, vector<1x4x256xf32>,
    %c1 = arith.constant 1 : index
    %c0_31 = arith.constant 0 : index
    %c0_32 = arith.constant 0 : index
    %35 = vector.load %arg2[%c1, %c0_31, %c0_32] : memref<2x4x256xf32, #tpu.memory_space<vmem>>, vector<1x4x256xf32>
    %36 = vector.shape_cast %35 : vector<1x4x256xf32> to vector<4x256xf32>
    %37 = vector.broadcast %0 : vector<1x256xf32> to vector<4x256xf32>
    %38 = arith.mulf %36, %37 : vector<4x256xf32>
    %c1_33 = arith.constant 1 : index
    %c0_34 = arith.constant 0 : index
    %c0_35 = arith.constant 0 : index
    %39 = vector.load %arg3[%c1_33, %c0_34, %c0_35] : memref<2x4x256xf32, #tpu.memory_space<vmem>>, vector<1x4x256xf32>
    %40 = vector.shape_cast %39 : vector<1x4x256xf32> to vector<4x256xf32>
    %41 = vector.broadcast %0 : vector<1x256xf32> to vector<4x256xf32>
    %42 = arith.mulf %40, %41 : vector<4x256xf32>
    %cst_36 = arith.constant dense<0.000000e+00> : vector<8x256xf32>
    %43 = tpu.matmul %1, %38, %cst_36 {dimension_numbers = #tpu.dot_dimension_numbers<[1], [0], [0], [1], [0, 0, 1, 1], [], []>} : vector<8x4xf32>, vector<4x256xf32>, vector<8x256xf32> -> vector<8x256xf32>
    %cst_37 = arith.constant dense<0.000000e+00> : vector<8x256xf32>
    %44 = tpu.matmul %2, %42, %cst_37 {dimension_numbers = #tpu.dot_dimension_numbers<[1], [0], [0], [1], [0, 0, 1, 1], [], []>} : vector<8x4xf32>, vector<4x256xf32>, vector<8x256xf32> -> vector<8x256xf32>
    %45 = arith.addf %43, %44 : vector<8x256xf32>
    %46 = vector.broadcast %3 : vector<8x1xf32> to vector<8x256xf32>
    %47 = arith.addf %45, %46 : vector<8x256xf32>
    %cst_38 = arith.constant 0.000000e+00 : f32
    %48 = vector.broadcast %cst_38 : f32 to vector<8x256xf32>
    %49 = arith.maximumf %47, %48 : vector<8x256xf32>
    %cst_39 = arith.constant dense<0.000000e+00> : vector<4x256xf32>
    %50 = tpu.matmul %4, %49, %cst_39 {dimension_numbers = #tpu.dot_dimension_numbers<[1], [0], [0], [1], [0, 0, 1, 1], [], []>} : vector<4x8xf32>, vector<8x256xf32>, vector<4x256xf32> -> vector<4x256xf32>
    %51 = vector.broadcast %6 : vector<4x1xf32> to vector<4x256xf32>
    %52 = arith.addf %50, %51 : vector<4x256xf32>
    %c1_40 = arith.constant 1 : index
    %c0_41 = arith.constant 0 : index
    %c0_42 = arith.constant 0 : index
    %53 = vector.load %arg12[%c1_40, %c0_41, %c0_42] : memref<2x4x256xf32, #tpu.memory_space<vmem>>, vector<1x4x256xf32>
    %54 = vector.shape_cast %53 : vector<1x4x256xf32> to vector<4x256xf32>
    %55 = vector.shape_cast %52 : vector<4x256xf32> to vector<1x4x256xf32>
    tpu.vector_store %arg12[%c1_40, %c0_41, %c0_42], %55 {strides = array<i32>} : memref<2x4x256xf32, #tpu.memory_space<vmem>>, vector<1x4x256xf32>,
    %cst_43 = arith.constant dense<0.000000e+00> : vector<4x256xf32>
    %56 = tpu.matmul %5, %49, %cst_43 {dimension_numbers = #tpu.dot_dimension_numbers<[1], [0], [0], [1], [0, 0, 1, 1], [], []>} : vector<4x8xf32>, vector<8x256xf32>, vector<4x256xf32> -> vector<4x256xf32>
    %57 = vector.broadcast %7 : vector<4x1xf32> to vector<4x256xf32>
    %58 = arith.addf %56, %57 : vector<4x256xf32>
    %c1_44 = arith.constant 1 : index
    %c0_45 = arith.constant 0 : index
    %c0_46 = arith.constant 0 : index
    %59 = vector.load %arg13[%c1_44, %c0_45, %c0_46] : memref<2x4x256xf32, #tpu.memory_space<vmem>>, vector<1x4x256xf32>
    %60 = vector.shape_cast %59 : vector<1x4x256xf32> to vector<4x256xf32>
    %61 = vector.shape_cast %58 : vector<4x256xf32> to vector<1x4x256xf32>
    tpu.vector_store %arg13[%c1_44, %c0_45, %c0_46], %61 {strides = array<i32>} : memref<2x4x256xf32, #tpu.memory_space<vmem>>, vector<1x4x256xf32>,
    return
  }
  func.func @transform_0(%arg0: i32, %arg1: i32) -> (i32, i32, i32) {
    %c0_i32 = arith.constant 0 : i32
    %c0_i32_0 = arith.constant 0 : i32
    return %arg1, %c0_i32, %arg0 : i32, i32, i32
  }
  func.func @transform_1(%arg0: i32, %arg1: i32) -> (i32, i32, i32) {
    %c0_i32 = arith.constant 0 : i32
    %c0_i32_0 = arith.constant 0 : i32
    return %arg1, %c0_i32, %arg0 : i32, i32, i32
  }
  func.func @transform_2(%arg0: i32, %arg1: i32) -> (i32, i32) {
    %c0_i32 = arith.constant 0 : i32
    %c0_i32_0 = arith.constant 0 : i32
    return %c0_i32, %arg0 : i32, i32
  }
  func.func @transform_3(%arg0: i32, %arg1: i32) -> (i32, i32) {
    %c0_i32 = arith.constant 0 : i32
    %c0_i32_0 = arith.constant 0 : i32
    %c0_i32_1 = arith.constant 0 : i32
    return %c0_i32, %c0_i32_0 : i32, i32
  }
  func.func @transform_4(%arg0: i32, %arg1: i32) -> (i32, i32) {
    %c0_i32 = arith.constant 0 : i32
    %c0_i32_0 = arith.constant 0 : i32
    %c0_i32_1 = arith.constant 0 : i32
    return %c0_i32, %c0_i32_0 : i32, i32
  }
  func.func @transform_5(%arg0: i32, %arg1: i32) -> (i32, i32) {
    %c0_i32 = arith.constant 0 : i32
    %c0_i32_0 = arith.constant 0 : i32
    %c0_i32_1 = arith.constant 0 : i32
    return %c0_i32, %c0_i32_0 : i32, i32
  }
  func.func @transform_6(%arg0: i32, %arg1: i32) -> (i32, i32) {
    %c0_i32 = arith.constant 0 : i32
    %c0_i32_0 = arith.constant 0 : i32
    %c0_i32_1 = arith.constant 0 : i32
    return %c0_i32, %c0_i32_0 : i32, i32
  }
  func.func @transform_7(%arg0: i32, %arg1: i32) -> (i32, i32) {
    %c0_i32 = arith.constant 0 : i32
    %c0_i32_0 = arith.constant 0 : i32
    %c0_i32_1 = arith.constant 0 : i32
    return %c0_i32, %c0_i32_0 : i32, i32
  }
  func.func @transform_8(%arg0: i32, %arg1: i32) -> (i32, i32) {
    %c0_i32 = arith.constant 0 : i32
    %c0_i32_0 = arith.constant 0 : i32
    %c0_i32_1 = arith.constant 0 : i32
    return %c0_i32, %c0_i32_0 : i32, i32
  }
  func.func @transform_9(%arg0: i32, %arg1: i32) -> (i32, i32) {
    %c0_i32 = arith.constant 0 : i32
    %c0_i32_0 = arith.constant 0 : i32
    %c0_i32_1 = arith.constant 0 : i32
    return %c0_i32, %c0_i32_0 : i32, i32
  }
  func.func @transform_10(%arg0: i32, %arg1: i32) -> (i32, i32, i32) {
    %c0_i32 = arith.constant 0 : i32
    %c0_i32_0 = arith.constant 0 : i32
    return %arg1, %c0_i32, %arg0 : i32, i32, i32
  }
  func.func @transform_11(%arg0: i32, %arg1: i32) -> (i32, i32, i32) {
    %c0_i32 = arith.constant 0 : i32
    %c0_i32_0 = arith.constant 0 : i32
    return %arg1, %c0_i32, %arg0 : i32, i32, i32
  }
}

</mosaic_0001>

<bundles_post_ra>
// kernel: hfm_forward.1
= control target key start
LH: loop header
LB: loop body
LE: loop exit
PB: predicated region body
PF: predicated region fallthrough
CT: control target
= control target key end

     0   :  { %v47_v0 = vlaneseq  ;;  %v754_v1 = vmov 0.0   ;;  %v755_v3 = vmov 0   ;;  %vm66_vm0 = vcmask 1043456   ;;  %s888_s2 = inlined_call_operand.vmem [shape: f32[1,256], index: 2, kind: input, shape index: {}]   ;;  %s889_s5 = inlined_call_operand.vmem [shape: f32[8,1], index: 5, kind: input, shape index: {}]   ;;  %s890_s8 = inlined_call_operand.vmem [shape: f32[4,1], index: 8, kind: input, shape index: {}]   ;;  %s891_s1 = inlined_call_operand.vmem [shape: f32[2,4,256], index: 1, kind: input, shape index: {}]   ;;  %s892_s0 = inlined_call_operand.vmem [shape: f32[2,4,256], index: 0, kind: input, shape index: {}]   ;;  %s893_s4 = inlined_call_operand.vmem [shape: f32[8,4], index: 4, kind: input, shape index: {}]   ;;  %s894_s3 = inlined_call_operand.vmem [shape: f32[8,4], index: 3, kind: input, shape index: {}]   ;;  %s895_s9 = inlined_call_operand.vmem [shape: f32[4,1], index: 9, kind: input, shape index: {}]   ;;  %s896_s6 = inlined_call_operand.vmem [shape: f32[4,8], index: 6, kind: input, shape index: {}]   ;;  %s897_s7 = inlined_call_operand.vmem [shape: f32[4,8], index: 7, kind: input, shape index: {}]   ;;  %s898_s10 = inlined_call_operand.vmem [shape: f32[2,4,256], index: 10, kind: output, shape index: {0}]   ;;  %s899_s11 = inlined_call_operand.vmem [shape: f32[2,4,256], index: 11, kind: output, shape index: {1}]  }
   0x1   :  { %135 = vmatprep.mubr.f32.mxu0 %v754_v1  ;;  %304 = vmatprep.mubr.f32.mxu1 %v754_v1  ;;  %v37_v4 = vld [vmem:[%s888_s2] sm:$0x3]  ;;  %v735_v12 = vld [vmem:[%s891_s1 + $0x8] sm:$0xff]  ;;  %vm62_vm1 = vcmask 31744   ;;  %vm236_vm2 = vcmask 64512  }
   0x2   :  { %v48_v2 = vshrl.u32 %v47_v0, 7  ;;  %752 = vset.pattern.permute.xlu0 %v755_v3  ;;  %753 = vset.pattern.permute.xlu1 %v755_v3  ;;  %v40_v5 = vld [vmem:[%s889_s5] sm:$0xff]  ;;  %v734_v22 = vld [vmem:[%s892_s0 + $0x8] sm:$0xff] }
   0x3   :  { %224 = vperm.xlu0 %752, %v40_v5   ;;  %v43_v8 = vld [vmem:[%s890_s8] sm:$0xf] }
   0x4   :  { %v49_v6 = vsub.s32 0, %v48_v2  ;;  %v53_v7 = vsub.s32 1, %v48_v2  ;;  %v58_v11 = vld [vmem:[%s891_s1] sm:$0xff] }
   0x5   :  { %v45_v13 = vld [vmem:[%s892_s0] sm:$0xff] }
   0x6   :  { %v50_v9 = vrot.slane %v37_v4, %v49_v6  ;;  %v54_v10 = vrot.slane %v37_v4, %v53_v7  ;;  %v39_v20 = vld [vmem:[%s893_s4] sm:$0xff] }
   0x7   :  { %233 = vperm.xlu0 %752, %v43_v8   ;;  %v38_v24 = vld [vmem:[%s894_s3] sm:$0xff] }
   0x8   :  { %v55_v14 = vcombine.low %v50_v9, %v54_v10  ;;  %v44_v26 = vld [vmem:[%s895_s9] sm:$0xf] }
   0x9   :  { %318 = vperm.xlu1 %753, %v44_v26   ;;  %v41_v34 = vld [vmem:[%s896_s6] sm:$0xf] }
   0xa   :  { %v59_v15 = vmul.f32 %v58_v11, %v55_v14  ;;  %v405_v16 = vmul.f32 %v735_v12, %v55_v14  ;;  %v57_v17 = vmul.f32 %v55_v14, %v45_v13  ;;  %v402_v23 = vmul.f32 %v734_v22, %v55_v14  ;;  %v42_v35 = vld [vmem:[%s897_s7] sm:$0xf] }
   0xc   :  { %v61_v18 = vcombine.high %v59_v15, %v59_v15  ;;  %v143_v19 = vcombine.high %v57_v17, %v57_v17  ;;  %v407_v21 = vcombine.high %v405_v16, %v405_v16  ;;  %v484_v25 = vcombine.high %v402_v23, %v402_v23 }
   0xe   :  { %726 = vmatprep.subr.msk.mxu0 %vm66_vm0, %v61_v18 }
   0xf   :  { %727 = vmatpush1.msk.msra.mxu0 %vm66_vm0, %v59_v15 }
  0x10   :  { %728 = vmatmul.mubr.msk.f32.vlgmr.msra.gmra.mrb[0].mxu0 %vm62_vm1, %v39_v20  ;;  %729 = vmatprep.subr.msk.mxu0 %vm66_vm0, %v143_v19 }
  0x11   :  { %730 = vmatpush1.msk.msra.mxu0 %vm66_vm0, %v57_v17  ;;  %215 = vmatprep.mubr.f32.mxu0 %v754_v1 }
  0x12   :  { %736 = vmatprep.subr.msk.mxu0 %vm66_vm0, %v407_v21 }
  0x18   :  { %731 = vmatmul.mubr.msk.f32.vlgmr.msra.gmra.mrb[0].mxu0 %vm62_vm1, %v38_v24 }
  0x19   :  { %737 = vmatpush1.msk.msra.mxu0 %vm66_vm0, %v405_v16  ;;  %476 = vmatprep.mubr.f32.mxu0 %v754_v1 }
  0x1a   :  { %739 = vmatprep.subr.msk.mxu0 %vm66_vm0, %v484_v25 }
  0x1c   :  { %738 = vmatmul.mubr.msk.f32.vlgmr.msra.gmra.mrb[2].mxu0 %vm62_vm1, %v39_v20 }
  0x1d   :  { %740 = vmatpush1.msk.msra.mxu0 %vm66_vm0, %v402_v23  ;;  %553 = vmatprep.mubr.f32.mxu0 %v754_v1 }
  0x24   :  { %741 = vmatmul.mubr.msk.f32.vlgmr.msra.gmra.mrb[2].mxu0 %vm62_vm1, %v38_v24 }
  0x82   :  { %v225_v27 = vpop.permute.xlu0 %224 }
  0x86   :  { %v234_v42 = vpop.permute.xlu0 %233 }
  0x88   :  { %v319_v47 = vpop.permute.xlu1 %318 }
  0xeb   :  { %v217_v28 = vpop.f32.mrb[0].mxu0 }
  0xec   :  { %v227_v29 = vadd.f32 %v225_v27, %v217_v28  ;;  %v219_v30 = vpop.f32.mrb[1].mxu0 }
  0xed   :  { %v228_v31 = vadd.f32 %v225_v27, %v219_v30 }
  0xee   :  { %v229_v33 = vmax.f32 %v227_v29, 0.0 }
  0xef   :  { %v230_v32 = vmax.f32 %v228_v31, 0.0 }
  0xf1   :  { %240 = vmatprep.subr.mxu1 %v230_v32 }
  0xf2   :  { %241 = vmatpush1.msra.mxu1 %v229_v33 }
  0xf3   :  { %732 = vmatmul.mubr.msk.f32.vlgmr.msra.gmra.mrb[0].mxu1 %vm236_vm2, %v41_v34  ;;  %324 = vmatprep.subr.mxu1 %v230_v32 }
  0xf4   :  { %325 = vmatpush1.msra.mxu1 %v229_v33  ;;  %388 = vmatprep.mubr.f32.mxu1 %v754_v1 }
  0xf7   :  { %v555_v36 = vpop.f32.mrb[2].mxu0  ;;  %733 = vmatmul.mubr.msk.f32.vlgmr.msra.gmra.mrb[2].mxu1 %vm236_vm2, %v42_v35 }
  0xf8   :  { %v560_v37 = vadd.f32 %v555_v36, %v225_v27  ;;  %v557_v38 = vpop.f32.mrb[3].mxu0  ;;  %628 = vmatprep.mubr.f32.mxu1 %v754_v1 }
  0xf9   :  { %v561_v39 = vadd.f32 %v557_v38, %v225_v27 }
  0xfa   :  { %v562_v41 = vmax.f32 %v560_v37, 0.0 }
  0xfb   :  { %v563_v40 = vmax.f32 %v561_v39, 0.0 }
  0xfd   :  { %564 = vmatprep.subr.mxu1 %v563_v40 }
  0xfe   :  { %565 = vmatpush1.msra.mxu1 %v562_v41 }
  0xff   :  { %742 = vmatmul.mubr.msk.f32.vlgmr.msra.gmra.mrb[4].mxu1 %vm236_vm2, %v41_v34  ;;  %641 = vmatprep.subr.mxu1 %v563_v40 }
 0x100   :  { %642 = vmatpush1.msra.mxu1 %v562_v41  ;;  %705 = vmatprep.mubr.f32.mxu1 %v754_v1 }
 0x103   :  { %744 = vmatmul.mubr.msk.f32.vlgmr.msra.gmra.mrb[6].mxu1 %vm236_vm2, %v42_v35 }
 0x1c6   :  { %v306_v43 = vpop.f32.mrb[0].mxu1 }
 0x1c7   :  { %v307_v44 = vadd.f32 %v306_v43, %v234_v42  ;;  %v308_v45 = vpop.f32.mrb[1].mxu1 }
 0x1c8   :  { %v309_v46 = vadd.f32 %v308_v45, %v234_v42 }
 0x1ca   :  { %v313_v48 = vcombine.low %v307_v44, %v309_v46  ;;  %v390_v49 = vpop.f32.mrb[2].mxu1 }
 0x1cb   :  { %v391_v50 = vadd.f32 %v390_v49, %v319_v47  ;;  %v392_v51 = vpop.f32.mrb[3].mxu1 }
 0x1cc   :  { %315 = vst [vmem:[%s898_s10] sm:$0xff] %v313_v48  ;;  %v393_v52 = vadd.f32 %v392_v51, %v319_v47 }
 0x1ce   :  { %v397_v53 = vcombine.low %v391_v50, %v393_v52 }
 0x1d0   :  { %399 = vst [vmem:[%s899_s11] sm:$0xff] %v397_v53 }
 0x1d2   :  { %v630_v54 = vpop.f32.mrb[4].mxu1 }
 0x1d3   :  { %v631_v55 = vadd.f32 %v630_v54, %v234_v42  ;;  %v632_v56 = vpop.f32.mrb[5].mxu1 }
 0x1d4   :  { %v633_v57 = vadd.f32 %v632_v56, %v234_v42 }
 0x1d6   :  { %v637_v58 = vcombine.low %v631_v55, %v633_v57  ;;  %v707_v59 = vpop.f32.mrb[6].mxu1 }
 0x1d7   :  { %v708_v60 = vadd.f32 %v707_v59, %v319_v47  ;;  %v709_v61 = vpop.f32.mrb[7].mxu1 }
 0x1d8   :  { %743 = vst [vmem:[%s898_s10 + $0x8] sm:$0xff] %v637_v58  ;;  %v710_v62 = vadd.f32 %v709_v61, %v319_v47 }
 0x1da   :  { %v714_v63 = vcombine.low %v708_v60, %v710_v62 }
 0x1dc   :  { %745 = vst [vmem:[%s899_s11 + $0x8] sm:$0xff] %v714_v63 }

</bundles_post_ra>
